<compile_context>
chip_gen: v6e
topology: v6e:2x2x1
jax: 0.10.0
libtpu: 0.0.40
codegen_flags: <defaults>
</compile_context>

<pallas_src>
import math

import jax
import jax.numpy as jnp
from jax.experimental import pallas as pl
from jax.experimental.pallas import tpu as pltpu

# ----------------------------- hyperparameters (module defaults) -------------
N_ATTRS = 3
DIM_IN = 128
DIM_HID = 128
DIM_OUT = 128
B = 2
LENGTH = 16
# n_heads=8 / n_layers=2 only parameterize the unused self.attns modules.

# Packed weight-slab row offsets (static).
_W_IN_OFF = 0                          # rows [0, 384): proj_in (one 128-row chunk per attr)
_W_MID_OFF = N_ATTRS * DIM_IN          # rows [384, 512): proj_mid
_W_OUT_OFF = _W_MID_OFF + DIM_HID      # rows [512, 640): proj_out
_W_ROWS = _W_OUT_OFF + DIM_HID         # 640


# ----------------------------- tanh-approx GELU ------------------------------
def _gelu_tanh(x):
    # 0.5*x*(1 + tanh(sqrt(2/pi)*(x + 0.044715*x^3))).  tanh lowers to the EUP
    # (its own VLIW slot), cutting VALU work vs. the erf polynomial.  Max abs
    # error vs. exact erf-GELU ~1e-3, far below the test tolerance.
    c = 0.7978845608028654  # sqrt(2/pi)
    return 0.5 * x * (1.0 + jnp.tanh(c * (x + 0.044715 * (x * x * x))))


# ----------------------------- fused forward kernel --------------------------
def _attr_projector_kernel(attr_ref, w_ref, b_ref, out_ref):
    a = attr_ref[...]                                    # (B, n_attrs, dim_in) f32
    bsz = a.shape[0]

    # ---- layer 1: proj_in over the flattened attrs, expressed as a sum of
    # N_ATTRS K=128 matmuls (no (B,3,128)->(B,384) relayout needed).
    acc = jnp.zeros((bsz, DIM_HID), jnp.float32)
    for i in range(N_ATTRS):
        a_i = a[:, i, :].astype(jnp.bfloat16)            # (B, dim_in)
        w_i = w_ref[_W_IN_OFF + i * DIM_IN:_W_IN_OFF + (i + 1) * DIM_IN, :]
        acc = acc + jnp.dot(a_i, w_i, preferred_element_type=jnp.float32)
    h = _gelu_tanh(acc + b_ref[0:1, :])                  # (B, dim_hid) f32

    # ---- layer 2: proj_mid
    h = _gelu_tanh(
        jnp.dot(h.astype(jnp.bfloat16),
                w_ref[_W_MID_OFF:_W_MID_OFF + DIM_HID, :],
                preferred_element_type=jnp.float32) + b_ref[1:2, :])

    # ---- layer 3: proj_out.  unsqueeze(1).expand(-1, length, -1) followed by
    # a per-position Linear == broadcast of the per-row projection over length.
    o = (jnp.dot(h.astype(jnp.bfloat16),
                 w_ref[_W_OUT_OFF:_W_OUT_OFF + DIM_HID, :],
                 preferred_element_type=jnp.float32) + b_ref[2:3, :])
    out_ref[...] = jnp.broadcast_to(o[:, None, :], out_ref.shape).astype(out_ref.dtype)


def attr_projector_forward(params, attr, length):
    """attr: (B, n_attrs, dim_in) f32 -> (B, length, dim_out) f32."""
    bsz = attr.shape[0]
    vmem = pl.BlockSpec(memory_space=pltpu.MemorySpace.VMEM)
    flops = 2 * bsz * (N_ATTRS * DIM_IN * DIM_HID
                       + DIM_HID * DIM_HID
                       + DIM_HID * DIM_OUT)
    bytes_accessed = (attr.size * attr.dtype.itemsize
                      + params['w'].size * params['w'].dtype.itemsize
                      + params['b'].size * params['b'].dtype.itemsize
                      + bsz * length * DIM_OUT * 4)
    return pl.pallas_call(
        _attr_projector_kernel,
        in_specs=[vmem, vmem, vmem],
        out_specs=vmem,
        out_shape=jax.ShapeDtypeStruct((bsz, length, DIM_OUT), jnp.float32),
        cost_estimate=pl.CostEstimate(
            flops=flops,
            transcendentals=2 * bsz * DIM_HID,   # two tanh-GELU layers
            bytes_accessed=bytes_accessed),
    )(attr, params['w'], params['b'])


# ----------------------------- params / reference ----------------------------
def init_params(key):
    ks = jax.random.split(key, 6)

    def w(k, fan_in, shape):
        return jax.random.normal(k, shape, jnp.float32) / math.sqrt(fan_in)

    # Weights stored pre-transposed as (in, out): y = x @ W + b (== torch x @ W.T + b).
    w_in = w(ks[0], N_ATTRS * DIM_IN, (N_ATTRS * DIM_IN, DIM_HID))
    w_mid = w(ks[2], DIM_HID, (DIM_HID, DIM_HID))
    w_out = w(ks[4], DIM_HID, (DIM_HID, DIM_OUT))
    b_in = 0.1 * jax.random.normal(ks[1], (DIM_HID,), jnp.float32)
    b_mid = 0.1 * jax.random.normal(ks[3], (DIM_HID,), jnp.float32)
    b_out = 0.1 * jax.random.normal(ks[5], (DIM_OUT,), jnp.float32)

    # Pack into one bf16 weight slab + one f32 bias slab (3 kernel operands).
    w_slab = jnp.concatenate([w_in, w_mid, w_out], axis=0).astype(jnp.bfloat16)
    assert w_slab.shape == (_W_ROWS, DIM_HID)
    b_slab = jnp.stack([b_in, b_mid, b_out], axis=0)     # (3, 128) f32

    # Keep the unpacked f32 originals only for the pure-JAX reference check.
    return dict(w=w_slab, b=b_slab,
                w_in=w_in, b_in=b_in, w_mid=w_mid, b_mid=b_mid,
                w_out=w_out, b_out=b_out)


def reference(params, attr, length):
    a = attr.reshape(attr.shape[0], -1)
    h = jax.nn.gelu(a @ params['w_in'] + params['b_in'], approximate=False)
    h = jax.nn.gelu(h @ params['w_mid'] + params['b_mid'], approximate=False)
    o = h @ params['w_out'] + params['b_out']
    return jnp.broadcast_to(o[:, None, :], (attr.shape[0], length, o.shape[-1]))


# ----------------------------- main -------------------------------------------
if __name__ == "__main__":
    key = jax.random.PRNGKey(0)
    kp, ka = jax.random.split(key)
    params = init_params(kp)
    attr = jax.random.normal(ka, (B, N_ATTRS, DIM_IN), jnp.float32)

    fwd = jax.jit(attr_projector_forward, static_argnums=2)
    out = jax.block_until_ready(fwd(params, attr, LENGTH))

    assert out.shape == (B, LENGTH, DIM_OUT), out.shape
    assert bool(jnp.all(jnp.isfinite(out)))
    err = float(jnp.max(jnp.abs(out - reference(params, attr, LENGTH))))
    # bf16 matmul operands + tanh-GELU trade ~1e-2 worst-case precision vs the
    # exact-erf f32 reference (per perf review); keep a modest tolerance.
    assert err < 3e-2, f"mismatch vs reference: {err}"
    print("KERNEL_OK")
</pallas_src>

<mosaic_0001>
module attributes {stable_mosaic.version = 11 : i64} {
  func.func @_attr_projector_kernel(%arg0: memref<2x3x128xf32, #tpu.memory_space<vmem>>, %arg1: memref<640x128xbf16, #tpu.memory_space<vmem>>, %arg2: memref<3x128xf32, #tpu.memory_space<vmem>>, %arg3: memref<2x16x128xf32, #tpu.memory_space<vmem>>) attributes {dimension_semantics = [], scalar_prefetch = 0 : i64, scratch_operands = 0 : i64, tpu.core_type = #tpu.core_type<tc>} {
    %c0 = arith.constant 0 : index
    %c0_0 = arith.constant 0 : index
    %c0_1 = arith.constant 0 : index
    %0 = vector.load %arg0[%c0, %c0_0, %c0_1] : memref<2x3x128xf32, #tpu.memory_space<vmem>>, vector<2x3x128xf32>
    %cst = arith.constant 0.000000e+00 : f32
    %1 = vector.broadcast %cst : f32 to vector<2x128xf32>
    %2 = vector.extract_strided_slice %0 {offsets = [0, 0, 0], sizes = [2, 1, 128], strides = [1, 1, 1]} : vector<2x3x128xf32> to vector<2x1x128xf32>
    %3 = vector.shape_cast %2 : vector<2x1x128xf32> to vector<2x128xf32>
    %4 = arith.truncf %3 : vector<2x128xf32> to vector<2x128xbf16>
    %c0_2 = arith.constant 0 : index
    %c0_3 = arith.constant 0 : index
    %5 = vector.load %arg1[%c0_2, %c0_3] : memref<640x128xbf16, #tpu.memory_space<vmem>>, vector<128x128xbf16>
    %cst_4 = arith.constant dense<0.000000e+00> : vector<2x128xf32>
    %6 = tpu.matmul %4, %5, %cst_4 {dimension_numbers = #tpu.dot_dimension_numbers<[1], [0], [0], [1], [0, 0, 1, 1], [], []>} : vector<2x128xbf16>, vector<128x128xbf16>, vector<2x128xf32> -> vector<2x128xf32>
    %7 = arith.addf %1, %6 : vector<2x128xf32>
    %8 = vector.extract_strided_slice %0 {offsets = [0, 1, 0], sizes = [2, 1, 128], strides = [1, 1, 1]} : vector<2x3x128xf32> to vector<2x1x128xf32>
    %9 = vector.shape_cast %8 : vector<2x1x128xf32> to vector<2x128xf32>
    %10 = arith.truncf %9 : vector<2x128xf32> to vector<2x128xbf16>
    %c128 = arith.constant 128 : index
    %c0_5 = arith.constant 0 : index
    %11 = vector.load %arg1[%c128, %c0_5] : memref<640x128xbf16, #tpu.memory_space<vmem>>, vector<128x128xbf16>
    %cst_6 = arith.constant dense<0.000000e+00> : vector<2x128xf32>
    %12 = tpu.matmul %10, %11, %cst_6 {dimension_numbers = #tpu.dot_dimension_numbers<[1], [0], [0], [1], [0, 0, 1, 1], [], []>} : vector<2x128xbf16>, vector<128x128xbf16>, vector<2x128xf32> -> vector<2x128xf32>
    %13 = arith.addf %7, %12 : vector<2x128xf32>
    %14 = vector.extract_strided_slice %0 {offsets = [0, 2, 0], sizes = [2, 1, 128], strides = [1, 1, 1]} : vector<2x3x128xf32> to vector<2x1x128xf32>
    %15 = vector.shape_cast %14 : vector<2x1x128xf32> to vector<2x128xf32>
    %16 = arith.truncf %15 : vector<2x128xf32> to vector<2x128xbf16>
    %c256 = arith.constant 256 : index
    %c0_7 = arith.constant 0 : index
    %17 = vector.load %arg1[%c256, %c0_7] : memref<640x128xbf16, #tpu.memory_space<vmem>>, vector<128x128xbf16>
    %cst_8 = arith.constant dense<0.000000e+00> : vector<2x128xf32>
    %18 = tpu.matmul %16, %17, %cst_8 {dimension_numbers = #tpu.dot_dimension_numbers<[1], [0], [0], [1], [0, 0, 1, 1], [], []>} : vector<2x128xbf16>, vector<128x128xbf16>, vector<2x128xf32> -> vector<2x128xf32>
    %19 = arith.addf %13, %18 : vector<2x128xf32>
    %c0_9 = arith.constant 0 : index
    %c0_10 = arith.constant 0 : index
    %20 = vector.load %arg2[%c0_9, %c0_10] : memref<3x128xf32, #tpu.memory_space<vmem>>, vector<1x128xf32>
    %21 = vector.broadcast %20 : vector<1x128xf32> to vector<2x128xf32>
    %22 = arith.addf %19, %21 : vector<2x128xf32>
    %cst_11 = arith.constant 5.000000e-01 : f32
    %23 = vector.broadcast %cst_11 : f32 to vector<2x128xf32>
    %24 = arith.mulf %23, %22 : vector<2x128xf32>
    %25 = arith.mulf %22, %22 : vector<2x128xf32>
    %26 = arith.mulf %25, %22 : vector<2x128xf32>
    %cst_12 = arith.constant 4.471500e-02 : f32
    %27 = vector.broadcast %cst_12 : f32 to vector<2x128xf32>
    %28 = arith.mulf %27, %26 : vector<2x128xf32>
    %29 = arith.addf %22, %28 : vector<2x128xf32>
    %cst_13 = arith.constant 0.797884583 : f32
    %30 = vector.broadcast %cst_13 : f32 to vector<2x128xf32>
    %31 = arith.mulf %30, %29 : vector<2x128xf32>
    %32 = math.tanh %31 : vector<2x128xf32>
    %cst_14 = arith.constant 1.000000e+00 : f32
    %33 = vector.broadcast %cst_14 : f32 to vector<2x128xf32>
    %34 = arith.addf %33, %32 : vector<2x128xf32>
    %35 = arith.mulf %24, %34 : vector<2x128xf32>
    %36 = arith.truncf %35 : vector<2x128xf32> to vector<2x128xbf16>
    %c384 = arith.constant 384 : index
    %c0_15 = arith.constant 0 : index
    %37 = vector.load %arg1[%c384, %c0_15] : memref<640x128xbf16, #tpu.memory_space<vmem>>, vector<128x128xbf16>
    %cst_16 = arith.constant dense<0.000000e+00> : vector<2x128xf32>
    %38 = tpu.matmul %36, %37, %cst_16 {dimension_numbers = #tpu.dot_dimension_numbers<[1], [0], [0], [1], [0, 0, 1, 1], [], []>} : vector<2x128xbf16>, vector<128x128xbf16>, vector<2x128xf32> -> vector<2x128xf32>
    %c1 = arith.constant 1 : index
    %c0_17 = arith.constant 0 : index
    %39 = vector.load %arg2[%c1, %c0_17] : memref<3x128xf32, #tpu.memory_space<vmem>>, vector<1x128xf32>
    %40 = vector.broadcast %39 : vector<1x128xf32> to vector<2x128xf32>
    %41 = arith.addf %38, %40 : vector<2x128xf32>
    %cst_18 = arith.constant 5.000000e-01 : f32
    %42 = vector.broadcast %cst_18 : f32 to vector<2x128xf32>
    %43 = arith.mulf %42, %41 : vector<2x128xf32>
    %44 = arith.mulf %41, %41 : vector<2x128xf32>
    %45 = arith.mulf %44, %41 : vector<2x128xf32>
    %cst_19 = arith.constant 4.471500e-02 : f32
    %46 = vector.broadcast %cst_19 : f32 to vector<2x128xf32>
    %47 = arith.mulf %46, %45 : vector<2x128xf32>
    %48 = arith.addf %41, %47 : vector<2x128xf32>
    %cst_20 = arith.constant 0.797884583 : f32
    %49 = vector.broadcast %cst_20 : f32 to vector<2x128xf32>
    %50 = arith.mulf %49, %48 : vector<2x128xf32>
    %51 = math.tanh %50 : vector<2x128xf32>
    %cst_21 = arith.constant 1.000000e+00 : f32
    %52 = vector.broadcast %cst_21 : f32 to vector<2x128xf32>
    %53 = arith.addf %52, %51 : vector<2x128xf32>
    %54 = arith.mulf %43, %53 : vector<2x128xf32>
    %55 = arith.truncf %54 : vector<2x128xf32> to vector<2x128xbf16>
    %c512 = arith.constant 512 : index
    %c0_22 = arith.constant 0 : index
    %56 = vector.load %arg1[%c512, %c0_22] : memref<640x128xbf16, #tpu.memory_space<vmem>>, vector<128x128xbf16>
    %cst_23 = arith.constant dense<0.000000e+00> : vector<2x128xf32>
    %57 = tpu.matmul %55, %56, %cst_23 {dimension_numbers = #tpu.dot_dimension_numbers<[1], [0], [0], [1], [0, 0, 1, 1], [], []>} : vector<2x128xbf16>, vector<128x128xbf16>, vector<2x128xf32> -> vector<2x128xf32>
    %c2 = arith.constant 2 : index
    %c0_24 = arith.constant 0 : index
    %58 = vector.load %arg2[%c2, %c0_24] : memref<3x128xf32, #tpu.memory_space<vmem>>, vector<1x128xf32>
    %59 = vector.broadcast %58 : vector<1x128xf32> to vector<2x128xf32>
    %60 = arith.addf %57, %59 : vector<2x128xf32>
    %61 = vector.shape_cast %60 : vector<2x128xf32> to vector<2x1x128xf32>
    %62 = vector.shape_cast %61 : vector<2x1x128xf32> to vector<2x1x128xf32>
    %63 = vector.broadcast %62 : vector<2x1x128xf32> to vector<2x16x128xf32>
    %c0_25 = arith.constant 0 : index
    %c0_26 = arith.constant 0 : index
    %c0_27 = arith.constant 0 : index
    %64 = vector.load %arg3[%c0_25, %c0_26, %c0_27] : memref<2x16x128xf32, #tpu.memory_space<vmem>>, vector<2x16x128xf32>
    tpu.vector_store %arg3[%c0_25, %c0_26, %c0_27], %63 {strides = array<i32>} : memref<2x16x128xf32, #tpu.memory_space<vmem>>, vector<2x16x128xf32>,
    return
  }
}

</mosaic_0001>

<bundles_post_ra>
// kernel: attr_projector_forward.1
= control target key start
LH: loop header
LB: loop body
LE: loop exit
PB: predicated region body
PF: predicated region fallthrough
CT: control target
= control target key end

     0   :  { %8 = vsyncpa [#allocation3], 0  ;;  %s1051_s0 = inlined_call_operand.vmem [shape: f32[2,3,128], index: 0, kind: input, shape index: {}]   ;;  %s1052_s1 = inlined_call_operand.hbm [shape: bf16[640,128], index: 1, kind: input, shape index: {}]   ;;  %s1053_s2 = inlined_call_operand.vmem [shape: f32[3,128], index: 2, kind: input, shape index: {}]   ;;  %s1054_s3 = inlined_call_operand.hbm [shape: f32[2,16,128], index: 3, kind: output, shape index: {}]  }
   0x1   :  { %9 = vsyncpa [#allocation4], 0  ;;  %s948_s12 = smov [#allocation2]  }
   0x2   :  { %s17_s13 = sshll.u32 %s948_s12, 4  ;;  %s18_s13 = int_to_ptr.vmem [resolvable:$true] %s17_s13 }
   0x3   :  { %s912_s14 = scalar_lea.vmem %s18_s13, 5120  ;;  %p917_p1 = scmp.lt.s32.totalorder %s18_s13, %s18_s13 }
   0x4   :  { %p913_p0 = scmp.ne.s32.totalorder %s18_s13, %s912_s14  ;;  %p918_p2 = scmp.lt.s32.totalorder %s912_s14, %s912_s14 }
   0x6   :  { %p919_p3 = por %p918_p2, %p917_p1 }
   0x8   :  { %p920_p4 = pnand %p919_p3, %p913_p0 }
   0xa   :  { %923 = shalt.err (!%p920_p4)
}
   0xb   :  { %s949_s15 = smov 64   ;;  %s950_s16 = smov 4  }
   0xc   :  { %23 = dma.hbm_to_vmem [thread:$0]  %s1052_s1, 5120, %s18_s13, [#allocation3], %s949_s15, %s949_s15, %s950_s16  }
   0xd   :  { %944 = dma.done.wait [#allocation3], 5120  }
   0xe   :  { %945 = vsyncadd [#allocation3], 4294962176  ;;  %v951_v0 = vmov 0.0   ;;  %vm952_vm0 = vmmov 0   ;;  %v860_v1 = vld [vmem:[#allocation2 + $0x78] sm:$0xff]   ;;  %v862_v3 = vld [vmem:[#allocation2 + $0x70] sm:$0xff]  }
   0xf   :  { %751 = vmatprep.subr.bf16.mxu0 %v951_v0  ;;  %771 = vmatprep.subr.bf16.mxu1 %v951_v0  ;;  %v861_v2 = vld [vmem:[#allocation2 + $0x38] sm:$0xff]   ;;  %v863_v4 = vld [vmem:[#allocation2 + $0x30] sm:$0xff]   ;;  %v864_v5 = vld [vmem:[#allocation2 + $0x68] sm:$0xff]   ;;  %vm71_vm1 = vcmask 1041409   ;;  %s954_s27 = smov [#allocation5]  }
  0x10   :  { %767 = vmatprep.mubr.msk.bf16.mxu0 %vm952_vm0, %v951_v0  ;;  %787 = vmatprep.mubr.msk.bf16.mxu1 %vm952_vm0, %v951_v0  ;;  %v865_v6 = vld [vmem:[#allocation2 + $0x28] sm:$0xff]   ;;  %v866_v7 = vld [vmem:[#allocation2 + $0x60] sm:$0xff]   ;;  %v868_v9 = vld [vmem:[#allocation2 + $0x58] sm:$0xff]   ;;  %s651_s28 = sshll.u32 %s954_s27, 4  ;;  %s652_s28 = int_to_ptr.vmem [resolvable:$true] %s651_s28 }
  0x11   :  { %752 = vmatpush3.bf16.msra.mxu0 %v860_v1  ;;  %772 = vmatpush3.bf16.msra.mxu1 %v861_v2  ;;  %v867_v8 = vld [vmem:[#allocation2 + $0x20] sm:$0xff]   ;;  %v869_v10 = vld [vmem:[#allocation2 + $0x18] sm:$0xff]   ;;  %v870_v15 = vld [vmem:[#allocation2 + $0x50] sm:$0xff]   ;;  %p929_p6 = scmp.lt.s32.totalorder %s652_s28, %s652_s28 }
  0x12   :  { %753 = vmatprep.subr.bf16.mxu0 %v951_v0  ;;  %773 = vmatprep.subr.bf16.mxu1 %v951_v0  ;;  %v30_v11 = vld [vmem:[%s1051_s0] sm:$0x7]  ;;  %v31_v12 = vld [vmem:[%s1051_s0 + $0x4] sm:$0x7]  ;;  %v871_v16 = vld [vmem:[#allocation2 + $0x10] sm:$0xff]  }
  0x13   :  { %v32_v13 = vpack.c.bf16 %v30_v11, %v30_v11  ;;  %v33_v14 = vpack.c.bf16 %v31_v12, %v31_v12  ;;  %v872_v19 = vld [vmem:[#allocation2 + $0x48] sm:$0xff]   ;;  %v874_v23 = vld [vmem:[#allocation2 + $0x40] sm:$0xff]   ;;  %v876_v27 = vld [vmem:[#allocation2 + $0xb8] sm:$0xff]  }
  0x14   :  { %v873_v21 = vld [vmem:[#allocation2 + $0x8] sm:$0xff]   ;;  %v875_v24 = vld [vmem:[#allocation2] sm:$0xff]   ;;  %v877_v30 = vld [vmem:[#allocation2 + $0xb0] sm:$0xff]  }
  0x15   :  { %754 = vmatpush3.bf16.msra.mxu0 %v862_v3  ;;  %774 = vmatpush3.bf16.msra.mxu1 %v863_v4  ;;  %v68_v17 = vunpack.c.l.b16 %v32_v13  ;;  %v69_v18 = vunpack.c.l.b16 %v33_v14  ;;  %v878_v31 = vld [vmem:[#allocation2 + $0xa8] sm:$0xff]   ;;  %v879_v32 = vld [vmem:[#allocation2 + $0xa0] sm:$0xff]   ;;  %v880_v33 = vld [vmem:[#allocation2 + $0x98] sm:$0xff]  }
  0x16   :  { %755 = vmatprep.subr.bf16.mxu0 %v951_v0  ;;  %775 = vmatprep.subr.bf16.mxu1 %v951_v0  ;;  %v881_v34 = vld [vmem:[#allocation2 + $0x90] sm:$0xff]   ;;  %v882_v35 = vld [vmem:[#allocation2 + $0x88] sm:$0xff]   ;;  %v883_v38 = vld [vmem:[#allocation2 + $0x80] sm:$0xff]  }
  0x17   :  { %v70_v20 = vrot.slane %v68_v17, 1  ;;  %v163_v22 = vrot.slane %v69_v18, 7  ;;  %v271_v36 = vrot.slane %v68_v17, 2  ;;  %v272_v37 = vrot.slane %v69_v18, 1  ;;  %v884_v41 = vld [vmem:[#allocation2 + $0xf8] sm:$0xff]   ;;  %v885_v42 = vld [vmem:[#allocation2 + $0xf0] sm:$0xff]  }
  0x18   :  { %v886_v43 = vld [vmem:[#allocation2 + $0xe8] sm:$0xff]   ;;  %v887_v44 = vld [vmem:[#allocation2 + $0xe0] sm:$0xff]   ;;  %v888_v45 = vld [vmem:[#allocation2 + $0xd8] sm:$0xff]  }
  0x19   :  { %756 = vmatpush3.bf16.msra.mxu0 %v864_v5  ;;  %776 = vmatpush3.bf16.msra.mxu1 %v865_v6  ;;  %v72_v25 = vsel %vm71_vm1, %v69_v18, %v70_v20  ;;  %v164_v26 = vsel %vm71_vm1, %v163_v22, %v68_v17  ;;  %v273_v39 = vsel %vm71_vm1, %v272_v37, %v271_v36  ;;  %v889_v46 = vld [vmem:[#allocation2 + $0xd0] sm:$0xff]   ;;  %v890_v47 = vld [vmem:[#allocation2 + $0xc8] sm:$0xff]   ;;  %v891_v48 = vld [vmem:[#allocation2 + $0xc0] sm:$0xff]   ;;  %v613_v37 = vlaneseq }
  0x1a   :  { %757 = vmatprep.subr.bf16.mxu0 %v951_v0  ;;  %777 = vmatprep.subr.bf16.mxu1 %v951_v0  ;;  %v73_v28 = vpack.c.b16 %v72_v25, %v72_v25  ;;  %v165_v29 = vpack.c.b16 %v164_v26, %v164_v26  ;;  %v274_v40 = vpack.c.b16 %v273_v39, %v273_v39  ;;  %v687_v59 = vld [vmem:[%s1053_s2] ss:$0 sm:$0xff]  ;;  %v892_v12 = vld [vmem:[#allocation2 + $0x138] sm:$0xff]   ;;  %v893_v13 = vld [vmem:[#allocation2 + $0x130] sm:$0xff]  }
  0x1b   :  { %v894_v14 = vld [vmem:[#allocation2 + $0x128] sm:$0xff]   ;;  %v897_v17 = vld [vmem:[#allocation2 + $0x110] sm:$0xff]   ;;  %v688_v20 = vld [vmem:[%s1053_s2 + $0x1] ss:$0 sm:$0xff]  ;;  %v614_v39 = vshrl.u32 %v613_v37, 7 }
  0x1c   :  { %v898_v18 = vld [vmem:[#allocation2 + $0x108] sm:$0xff]  }
  0x1d   :  { %758 = vmatpush3.bf16.msra.mxu0 %v866_v7  ;;  %778 = vmatpush3.bf16.msra.mxu1 %v867_v8 }
  0x1e   :  { %759 = vmatprep.subr.bf16.mxu0 %v951_v0  ;;  %779 = vmatprep.subr.bf16.mxu1 %v951_v0 }
  0x21   :  { %760 = vmatpush3.bf16.msra.mxu0 %v868_v9  ;;  %780 = vmatpush3.bf16.msra.mxu1 %v869_v10 }
  0x22   :  { %761 = vmatprep.subr.bf16.mxu0 %v951_v0  ;;  %781 = vmatprep.subr.bf16.mxu1 %v951_v0 }
  0x25   :  { %762 = vmatpush3.bf16.msra.mxu0 %v870_v15  ;;  %782 = vmatpush3.bf16.msra.mxu1 %v871_v16  ;;  %v895_v15 = vld [vmem:[#allocation2 + $0x120] sm:$0xff]   ;;  %v896_v16 = vld [vmem:[#allocation2 + $0x118] sm:$0xff]  }
  0x26   :  { %763 = vmatprep.subr.bf16.mxu0 %v951_v0  ;;  %783 = vmatprep.subr.bf16.mxu1 %v951_v0 }
  0x29   :  { %764 = vmatpush3.bf16.msra.mxu0 %v872_v19  ;;  %784 = vmatpush3.bf16.msra.mxu1 %v873_v21  ;;  %v899_v19 = vld [vmem:[#allocation2 + $0x100] sm:$0xff]  }
  0x2a   :  { %765 = vmatprep.subr.bf16.mxu0 %v951_v0  ;;  %785 = vmatprep.subr.bf16.mxu1 %v951_v0 }
  0x2d   :  { %766 = vmatpush3.bf16.msra.mxu0 %v874_v23  ;;  %786 = vmatpush3.bf16.msra.mxu1 %v875_v24 }
  0x2e   :  { %791 = vmatprep.subr.bf16.mxu0 %v951_v0  ;;  %811 = vmatprep.subr.bf16.mxu1 %v951_v0 }
  0x30   :  { %768 = vmatmul.mubr.bf16.vlgmr.msra.gmra.mxu0 %v73_v28  ;;  %788 = vmatmul.mubr.bf16.vlgmr.msra.gmra.mxu1 %v165_v29 }
  0x31   :  { %792 = vmatpush3.bf16.msra.mxu0 %v876_v27  ;;  %807 = vmatprep.mubr.msk.bf16.mxu0 %vm952_vm0, %v951_v0 }
  0x32   :  { %793 = vmatprep.subr.bf16.mxu0 %v951_v0  ;;  %827 = vmatprep.mubr.msk.bf16.mxu1 %vm952_vm0, %v951_v0 }
  0x33   :  { %812 = vmatpush3.bf16.msra.mxu1 %v884_v41 }
  0x34   :  { %813 = vmatprep.subr.bf16.mxu1 %v951_v0 }
  0x35   :  { %794 = vmatpush3.bf16.msra.mxu0 %v877_v30 }
  0x36   :  { %795 = vmatprep.subr.bf16.mxu0 %v951_v0 }
  0x37   :  { %814 = vmatpush3.bf16.msra.mxu1 %v885_v42 }
  0x38   :  { %815 = vmatprep.subr.bf16.mxu1 %v951_v0 }
  0x39   :  { %796 = vmatpush3.bf16.msra.mxu0 %v878_v31 }
  0x3a   :  { %797 = vmatprep.subr.bf16.mxu0 %v951_v0 }
  0x3b   :  { %816 = vmatpush3.bf16.msra.mxu1 %v886_v43 }
  0x3c   :  { %817 = vmatprep.subr.bf16.mxu1 %v951_v0 }
  0x3d   :  { %798 = vmatpush3.bf16.msra.mxu0 %v879_v32 }
  0x3e   :  { %799 = vmatprep.subr.bf16.mxu0 %v951_v0 }
  0x3f   :  { %818 = vmatpush3.bf16.msra.mxu1 %v887_v44 }
  0x40   :  { %819 = vmatprep.subr.bf16.mxu1 %v951_v0 }
  0x41   :  { %800 = vmatpush3.bf16.msra.mxu0 %v880_v33 }
  0x42   :  { %801 = vmatprep.subr.bf16.mxu0 %v951_v0 }
  0x43   :  { %820 = vmatpush3.bf16.msra.mxu1 %v888_v45 }
  0x44   :  { %821 = vmatprep.subr.bf16.mxu1 %v951_v0 }
  0x45   :  { %802 = vmatpush3.bf16.msra.mxu0 %v881_v34 }
  0x46   :  { %803 = vmatprep.subr.bf16.mxu0 %v951_v0 }
  0x47   :  { %822 = vmatpush3.bf16.msra.mxu1 %v889_v46  ;;  %v634_v46 = vsub.s32 0, %v614_v39 }
  0x48   :  { %823 = vmatprep.subr.bf16.mxu1 %v951_v0 }
  0x49   :  { %804 = vmatpush3.bf16.msra.mxu0 %v882_v35  ;;  %v953_v35 = vmov 1966171168  }
  0x4a   :  { %805 = vmatprep.subr.bf16.mxu0 %v951_v0  ;;  %v611_v36 = vunpack.c.l.s4 %v953_v35 }
  0x4b   :  { %824 = vmatpush3.bf16.msra.mxu1 %v890_v47 }
  0x4c   :  { %825 = vmatprep.subr.bf16.mxu1 %v951_v0 }
  0x4d   :  { %806 = vmatpush3.bf16.msra.mxu0 %v883_v38  ;;  %v612_v38 = vunpack.c.0.s8 %v611_v36 }
  0x4e   :  { %831 = vmatprep.subr.bf16.mxu0 %v951_v0 }
  0x4f   :  { %826 = vmatpush3.bf16.msra.mxu1 %v891_v48  ;;  %v615_v41 = vsub.s32 %v612_v38, %v614_v39 }
  0x50   :  { %808 = vmatmul.mubr.bf16.vlgmr.msra.gmra.mxu0 %v274_v40  ;;  %v697_v40 = vld [vmem:[%s1053_s2 + $0x2] ss:$0 sm:$0xff]  ;;  %s924_s2 = scalar_lea.vmem %s652_s28, 512 }
  0x51   :  { %847 = vmatprep.mubr.msk.bf16.mxu0 %vm952_vm0, %v951_v0  ;;  %832 = vmatpush3.bf16.msra.mxu0 %v892_v12  ;;  %p925_p5 = scmp.ne.s32.totalorder %s652_s28, %s924_s2  ;;  %p930_p7 = scmp.lt.s32.totalorder %s924_s2, %s924_s2 }
  0x52   :  { %833 = vmatprep.subr.bf16.mxu0 %v951_v0 }
  0x53   :  { %p931_p8 = por %p930_p7, %p929_p6 }
  0x55   :  { %834 = vmatpush3.bf16.msra.mxu0 %v893_v13  ;;  %p932_p9 = pnand %p931_p8, %p925_p5 }
  0x56   :  { %835 = vmatprep.subr.bf16.mxu0 %v951_v0 }
  0x59   :  { %836 = vmatpush3.bf16.msra.mxu0 %v894_v14 }
  0x5a   :  { %837 = vmatprep.subr.bf16.mxu0 %v951_v0 }
  0x5d   :  { %838 = vmatpush3.bf16.msra.mxu0 %v895_v15 }
  0x5e   :  { %839 = vmatprep.subr.bf16.mxu0 %v951_v0 }
  0x61   :  { %840 = vmatpush3.bf16.msra.mxu0 %v896_v16 }
  0x62   :  { %841 = vmatprep.subr.bf16.mxu0 %v951_v0 }
  0x65   :  { %842 = vmatpush3.bf16.msra.mxu0 %v897_v17 }
  0x66   :  { %843 = vmatprep.subr.bf16.mxu0 %v951_v0 }
  0x69   :  { %844 = vmatpush3.bf16.msra.mxu0 %v898_v18 }
  0x6a   :  { %845 = vmatprep.subr.bf16.mxu0 %v951_v0 }
  0x6d   :  { %846 = vmatpush3.bf16.msra.mxu0 %v899_v19 }
  0xf0   :  { %v157_v49 = vpop.f32.mrf.mxu0  ;;  %v249_v50 = vpop.f32.mrf.mxu1 }
  0xf1   :  { %v250_v57 = vadd.f32 %v249_v50, %v157_v49 }
  0xf2   :  { %v769_v51 = vpop.f32.mrf.mxu0  ;;  %v789_v52 = vpop.f32.mrf.mxu1 }
  0xf4   :  { %v160_v53 = vpop.f32.mrf.mxu0  ;;  %v252_v54 = vpop.f32.mrf.mxu1 }
  0xf6   :  { %v770_v55 = vpop.f32.mrf.mxu0  ;;  %v790_v56 = vpop.f32.mrf.mxu1 }
 0x110   :  { %v358_v58 = vpop.f32.mrf.mxu0 }
 0x111   :  { %v364_v60 = vadd.f32 %v358_v58, %v250_v57 }
 0x112   :  { %v809_v61 = vpop.f32.mrf.mxu0 }
 0x113   :  { %v370_v62 = vadd.f32 %v687_v59, %v364_v60 }
 0x114   :  { %v361_v63 = vpop.f32.mrf.mxu0 }
 0x115   :  { %v372_v1 = vmul.f32 %v370_v62, %v370_v62  ;;  %v371_v8 = vmul.f32 0.5, %v370_v62 }
 0x116   :  { %v810_v2 = vpop.f32.mrf.mxu0 }
 0x117   :  { %v373_v3 = vmul.f32 %v372_v1, %v370_v62 }
 0x119   :  { %v374_v4 = vmul.f32 0.044715, %v373_v3 }
 0x11b   :  { %v375_v5 = vadd.f32 %v374_v4, %v370_v62 }
 0x11d   :  { %v376_v6 = vmul.f32 0.7978846, %v375_v5 }
 0x11f   :  { %900 = vtanh.f32 %v376_v6 }
 0x12c   :  { %v901_v7 = vpop.eup %900 }
 0x12d   :  { %v378_v9 = vadd.f32 1.0, %v901_v7 }
 0x12f   :  { %v379_v10 = vmul.f32 %v378_v9, %v371_v8 }
 0x131   :  { %v380_v11 = vpack.c.bf16 %v379_v10, %v379_v10 }
 0x133   :  { %828 = vmatmul.mubr.bf16.vlgmr.msra.gmra.mxu1 %v380_v11 }
 0x1f3   :  { %v484_v21 = vpop.f32.mrf.mxu1 }
 0x1f4   :  { %v485_v22 = vadd.f32 %v688_v20, %v484_v21 }
 0x1f5   :  { %v829_v23 = vpop.f32.mrf.mxu1 }
 0x1f6   :  { %v491_v24 = vmul.f32 %v485_v22, %v485_v22  ;;  %v490_v32 = vmul.f32 0.5, %v485_v22 }
 0x1f7   :  { %v487_v25 = vpop.f32.mrf.mxu1 }
 0x1f8   :  { %v492_v26 = vmul.f32 %v491_v24, %v485_v22 }
 0x1f9   :  { %v830_v27 = vpop.f32.mrf.mxu1 }
 0x1fa   :  { %v493_v28 = vmul.f32 0.044715, %v492_v26 }
 0x1fc   :  { %v494_v29 = vadd.f32 %v493_v28, %v485_v22 }
 0x1fe   :  { %v495_v30 = vmul.f32 0.7978846, %v494_v29 }
 0x200   :  { %902 = vtanh.f32 %v495_v30 }
 0x20d   :  { %v903_v31 = vpop.eup %902 }
 0x20e   :  { %v497_v33 = vadd.f32 1.0, %v903_v31 }
 0x210   :  { %v498_v0 = vmul.f32 %v497_v33, %v490_v32 }
 0x212   :  { %v499_v34 = vpack.c.bf16 %v498_v0, %v498_v0 }
 0x214   :  { %848 = vmatmul.mubr.bf16.vlgmr.msra.gmra.mxu0 %v499_v34 }
 0x2d4   :  { %v603_v42 = vpop.f32.mrf.mxu0 }
 0x2d5   :  { %v604_v43 = vadd.f32 %v697_v40, %v603_v42 }
 0x2d6   :  { %v849_v44 = vpop.f32.mrf.mxu0 }
 0x2d7   :  { %v616_v45 = vrot.slane %v604_v43, %v615_v41 }
 0x2d8   :  { %v606_v47 = vpop.f32.mrf.mxu0 }
 0x2d9   :  { %v617_v48 = vcombine.high %v616_v45, %v616_v45  ;;  %v624_v49 = vrot.slane %v616_v45, %v615_v41 }
 0x2da   :  { %v850_v50 = vpop.f32.mrf.mxu0 }
 0x2db   :  { %v631_v51 = vrot.slane %v617_v48, %v615_v41  ;;  %v635_v52 = vrot.slane %v624_v49, %v634_v46 }
 0x2dd   :  { %v639_v53 = vrot.slane %v631_v51, %v634_v46  ;;  %642 = vst [vmem:[#allocation5] sm:$0xff] %v635_v52  ;;  %643 = vst [vmem:[#allocation5 + $0x8] sm:$0xff] %v635_v52 }
 0x2df   :  { %644 = vst [vmem:[#allocation5 + $0x10] sm:$0xff] %v639_v53  ;;  %645 = vst [vmem:[#allocation5 + $0x18] sm:$0xff] %v639_v53 }
 0x2e0   :  { %935 = shalt.err (!%p932_p9)
}
 0x2e1   :  { %s955_s29 = smov 128   ;;  %s956_s30 = smov 8  }
 0x2e2   :  { %657 = dma.vmem_to_hbm [thread:$0]  %s652_s28, 512, %s1054_s3, [#allocation4], %s955_s29, %s955_s29, %s956_s30  }
 0x2e3   :  { %946 = dma.done.wait [#allocation4], 512  }
 0x2e4   :  { %947 = vsyncadd [#allocation4], 4294966784 }
 0x2e5   :  { %661 = vsyncpa [#allocation3], 1 }
 0x2e6   :  { %662 = vsyncpa [#allocation4], 1 }

</bundles_post_ra>
